<compile_context>
chip_gen: v7x
topology: tpu7x:2x2x1
jax: 0.10.0
libtpu: 0.0.40
codegen_flags: <defaults>
</compile_context>

<pallas_src>
import functools

import jax
import jax.numpy as jnp
from jax.experimental import pallas as pl
from jax.experimental.pallas import tpu as pltpu


def _conv1x1_head_kernel(x_ref, w_ref, b_ref, o_ref, *, apply_softmax):
    # x_ref: (1, Cin, T)   activation tile (spatial on the lane axis)
    # w_ref: (Cout, Cin)   conv weight (constant index_map -> stays resident)
    # b_ref: (Cout, 1)     conv bias, f32
    # o_ref: (1, Cout, T)  output tile (lane-dense: last dim is spatial)
    x = x_ref[0]                                                 # (Cin, T)
    w = w_ref[...]                                               # (Cout, Cin)
    acc = jnp.dot(w, x, preferred_element_type=jnp.float32)      # (Cout, T) f32
    acc = acc + b_ref[...]                                       # bias in f32
    if apply_softmax:
        # Softmax over the channel (sublane) axis, per pixel.
        cout = acc.shape[0]
        if cout <= 8:
            # Unrolled over the tiny channel axis: pure lane-wise VPU ops,
            # avoids cross-sublane XLU reduce codegen.
            m = acc[0:1]
            for i in range(1, cout):
                m = jnp.maximum(m, acc[i:i + 1])
            e = jnp.exp(acc - m)
            s = e[0:1]
            for i in range(1, cout):
                s = s + e[i:i + 1]
        else:
            m = jnp.max(acc, axis=0, keepdims=True)
            e = jnp.exp(acc - m)
            s = jnp.sum(e, axis=0, keepdims=True)
        # EUP reciprocal (separate issue slot) instead of a VPU divide chain.
        acc = e * pl.reciprocal(s, approx=True)
    o_ref[0] = acc.astype(o_ref.dtype)


def _num_tensorcores():
    """Best-effort TensorCore-per-chip count (v7x = 2, v5e/v6e = 1)."""
    try:
        info = pltpu.get_tpu_info()
        for attr in ("num_cores", "tensorcore_count", "num_tensorcores",
                     "cores_per_chip", "num_cores_per_chip"):
            v = getattr(info, attr, None)
            if v:
                return int(v)
    except Exception:
        pass
    try:
        v = getattr(jax.devices()[0], "num_cores", None)
        if v:
            return int(v)
    except Exception:
        pass
    return 1


def _pick_tile_hw(HW, N, Cin, Cout, itemsize,
                  vmem_budget_bytes=10 * 1024 * 1024,
                  max_tile=32768,
                  num_cores=1):
    """Pick the spatial (lane) tile size.

    Largest multiple of 128 whose double-buffered in+out tiles fit the VMEM
    budget, capped at max_tile lanes.  Exact divisors of HW are preferred
    (no ragged block) when they are not much smaller than the cap; otherwise
    the last block is ragged and Pallas masks it (grid uses pl.cdiv).
    Tiles are only shrunk to create extra grid blocks when >1 TensorCore is
    present (v7x megacore sharding); never on single-TC chips.
    """
    if HW <= 128:
        return HW                       # single full-extent block
    cap = vmem_budget_bytes // (2 * (Cin + Cout) * itemsize)
    cap = max(128, min(cap, max_tile))
    tile = min(cap, HW)
    tile = max(128, (tile // 128) * 128)
    # Prefer an exact divisor of HW (no ragged last block) if it is at least
    # half the cap-derived tile; otherwise accept one masked ragged block.
    divisors = [t for t in range(128, HW + 1, 128) if HW % t == 0]
    exact = [t for t in divisors if t <= tile]
    if exact and max(exact) * 2 >= tile:
        tile = max(exact)
    # Only v7x (2 TCs) benefits from extra blocks; keep tiles big elsewhere.
    if num_cores > 1:
        min_blocks = 2 * num_cores
        while tile > 1024 and N * pl.cdiv(HW, tile) < min_blocks:
            tile = max(1024, (tile // 2 // 128) * 128)
    return tile


@functools.partial(jax.jit, static_argnames=("apply_softmax",))
def conv1x1_head_forward(x_nchw, weight, bias, apply_softmax=True):
    """outconv (1x1 Conv2d) [+ Softmax over channels], NCHW in / NCHW out.

    x_nchw : (N, Cin, H, W)   (pass bf16 for the HBM-bandwidth fast path)
    weight : (Cout, Cin)      -- the (Cout, Cin, 1, 1) conv weight squeezed
    bias   : (Cout,)
    """
    N, Cin, H, W = x_nchw.shape
    Cout = weight.shape[0]
    HW = H * W

    x_flat = x_nchw.reshape(N, Cin, HW)                 # no transpose, no copy
    w = weight.reshape(Cout, Cin).astype(x_nchw.dtype)  # matmul in input dtype
    b = bias.astype(jnp.float32).reshape(Cout, 1)       # bias add stays f32

    itemsize = jnp.dtype(x_nchw.dtype).itemsize
    tile = _pick_tile_hw(HW, N, Cin, Cout, itemsize,
                         num_cores=_num_tensorcores())
    grid = (N, pl.cdiv(HW, tile))

    kernel = functools.partial(_conv1x1_head_kernel, apply_softmax=apply_softmax)

    flops = 2 * N * Cout * Cin * HW
    transcendentals = N * Cout * HW if apply_softmax else 0
    bytes_accessed = ((N * Cin * HW + N * Cout * HW) * itemsize
                      + Cout * Cin * itemsize + Cout * 4)
    cost = pl.CostEstimate(flops=flops,
                           transcendentals=transcendentals,
                           bytes_accessed=bytes_accessed)

    out_flat = pl.pallas_call(
        kernel,
        out_shape=jax.ShapeDtypeStruct((N, Cout, HW), x_nchw.dtype),
        grid_spec=pltpu.PrefetchScalarGridSpec(
            num_scalar_prefetch=0,
            grid=grid,
            in_specs=[
                pl.BlockSpec((1, Cin, tile), lambda n, j: (n, 0, j)),
                pl.BlockSpec((Cout, Cin), lambda n, j: (0, 0)),
                pl.BlockSpec((Cout, 1), lambda n, j: (0, 0)),
            ],
            out_specs=pl.BlockSpec((1, Cout, tile), lambda n, j: (n, 0, j)),
        ),
        compiler_params=pltpu.CompilerParams(
            dimension_semantics=("parallel", "parallel"),
            vmem_limit_bytes=32 * 1024 * 1024,
        ),
        cost_estimate=cost,
    )(x_flat, w, b)

    return out_flat.reshape(N, Cout, H, W)


if __name__ == "__main__":
    # Shapes consistent with Net: the head is outconv = Conv2d(16, 3, k=1)
    # followed by Softmax(dim=1).
    N, Cin, H, W = 2, 16, 16, 16
    Cout = 3

    key = jax.random.PRNGKey(0)
    kx, kw, kb = jax.random.split(key, 3)
    x = jax.random.normal(kx, (N, Cin, H, W), dtype=jnp.float32)
    weight = jax.random.normal(kw, (Cout, Cin), dtype=jnp.float32) * 0.1
    bias = jax.random.normal(kb, (Cout,), dtype=jnp.float32) * 0.1

    # --- f32, conv only (same semantics as the PyTorch 1x1 conv) ---
    out_conv = jax.block_until_ready(
        conv1x1_head_forward(x, weight, bias, apply_softmax=False))
    ref_conv = jnp.einsum("nchw,oc->nohw", x, weight) + bias[None, :, None, None]
    assert out_conv.shape == (N, Cout, H, W)
    assert jnp.allclose(out_conv, ref_conv, atol=5e-3), "conv mismatch vs reference"

    # --- f32, fused channel softmax (matches Net.forward's final stage) ---
    out_sm = jax.block_until_ready(conv1x1_head_forward(x, weight, bias))
    ref_sm = jax.nn.softmax(ref_conv, axis=1)
    assert out_sm.shape == (N, Cout, H, W)
    assert jnp.allclose(out_sm, ref_sm, atol=5e-3), "softmax mismatch vs reference"

    # --- ragged spatial size (H*W not a multiple of 128; masked last block) ---
    Hr, Wr = 20, 20
    xr = jax.random.normal(kx, (N, Cin, Hr, Wr), dtype=jnp.float32)
    out_r = jax.block_until_ready(conv1x1_head_forward(xr, weight, bias))
    ref_r = jax.nn.softmax(
        jnp.einsum("nchw,oc->nohw", xr, weight) + bias[None, :, None, None],
        axis=1)
    assert out_r.shape == (N, Cout, Hr, Wr)
    assert jnp.allclose(out_r, ref_r, atol=5e-3), "ragged-HW mismatch vs reference"

    # --- bf16 I/O (halves HBM bytes; accumulation / bias / softmax stay f32) ---
    x_bf = x.astype(jnp.bfloat16)
    out_bf = jax.block_until_ready(conv1x1_head_forward(x_bf, weight, bias))
    w_bf = weight.astype(jnp.bfloat16).astype(jnp.float32)
    ref_bf = jax.nn.softmax(
        jnp.einsum("nchw,oc->nohw", x_bf.astype(jnp.float32), w_bf)
        + bias[None, :, None, None],
        axis=1,
    )
    assert out_bf.shape == (N, Cout, H, W)
    assert jnp.allclose(out_bf.astype(jnp.float32), ref_bf, atol=3e-2), "bf16 mismatch"

    print("KERNEL_OK")
</pallas_src>

<mosaic_0001>
module attributes {stable_mosaic.version = 11 : i64} {
  func.func @_conv1x1_head_kernel(%arg0: i32, %arg1: i32, %arg2: memref<1x16x256xf32, #tpu.memory_space<vmem>>, %arg3: memref<3x16xf32, #tpu.memory_space<vmem>>, %arg4: memref<3x1xf32, #tpu.memory_space<vmem>>, %arg5: memref<1x3x256xf32, #tpu.memory_space<vmem>>) attributes {dimension_semantics = [#tpu.dimension_semantics<parallel>, #tpu.dimension_semantics<parallel>], iteration_bounds = array<i64: 2, 1>, scalar_prefetch = 0 : i64, scratch_operands = 0 : i64, tpu.core_type = #tpu.core_type<tc>, window_params = [{transform_indices = @transform_0, window_bounds = array<i64: 1, 16, 256>}, {pipeline_mode = #tpu.pipeline_mode<synchronous>, transform_indices = @transform_1, window_bounds = array<i64: 3, 16>}, {pipeline_mode = #tpu.pipeline_mode<synchronous>, transform_indices = @transform_2, window_bounds = array<i64: 3, 1>}, {transform_indices = @transform_3, window_bounds = array<i64: 1, 3, 256>}]} {
    %c0 = arith.constant 0 : index
    %c0_0 = arith.constant 0 : index
    %c0_1 = arith.constant 0 : index
    %0 = vector.load %arg2[%c0, %c0_0, %c0_1] : memref<1x16x256xf32, #tpu.memory_space<vmem>>, vector<1x16x256xf32>
    %1 = vector.shape_cast %0 : vector<1x16x256xf32> to vector<16x256xf32>
    %c0_2 = arith.constant 0 : index
    %c0_3 = arith.constant 0 : index
    %2 = vector.load %arg3[%c0_2, %c0_3] : memref<3x16xf32, #tpu.memory_space<vmem>>, vector<3x16xf32>
    %cst = arith.constant dense<0.000000e+00> : vector<3x256xf32>
    %3 = tpu.matmul %2, %1, %cst {dimension_numbers = #tpu.dot_dimension_numbers<[1], [0], [0], [1], [0, 0, 1, 1], [], []>} : vector<3x16xf32>, vector<16x256xf32>, vector<3x256xf32> -> vector<3x256xf32>
    %c0_4 = arith.constant 0 : index
    %c0_5 = arith.constant 0 : index
    %4 = vector.load %arg4[%c0_4, %c0_5] : memref<3x1xf32, #tpu.memory_space<vmem>>, vector<3x1xf32>
    %5 = vector.broadcast %4 : vector<3x1xf32> to vector<3x256xf32>
    %6 = arith.addf %3, %5 : vector<3x256xf32>
    %c0_6 = arith.constant 0 : index
    %c0_7 = arith.constant 0 : index
    %c0_8 = arith.constant 0 : index
    %7 = vector.load %arg5[%c0_6, %c0_7, %c0_8] : memref<1x3x256xf32, #tpu.memory_space<vmem>>, vector<1x3x256xf32>
    %8 = vector.shape_cast %7 : vector<1x3x256xf32> to vector<3x256xf32>
    %9 = vector.shape_cast %6 : vector<3x256xf32> to vector<1x3x256xf32>
    tpu.vector_store %arg5[%c0_6, %c0_7, %c0_8], %9 {strides = array<i32>} : memref<1x3x256xf32, #tpu.memory_space<vmem>>, vector<1x3x256xf32>,
    return
  }
  func.func @transform_0(%arg0: i32, %arg1: i32) -> (i32, i32, i32) {
    %c0_i32 = arith.constant 0 : i32
    %c0_i32_0 = arith.constant 0 : i32
    return %arg0, %c0_i32, %arg1 : i32, i32, i32
  }
  func.func @transform_1(%arg0: i32, %arg1: i32) -> (i32, i32) {
    %c0_i32 = arith.constant 0 : i32
    %c0_i32_0 = arith.constant 0 : i32
    %c0_i32_1 = arith.constant 0 : i32
    return %c0_i32, %c0_i32_0 : i32, i32
  }
  func.func @transform_2(%arg0: i32, %arg1: i32) -> (i32, i32) {
    %c0_i32 = arith.constant 0 : i32
    %c0_i32_0 = arith.constant 0 : i32
    %c0_i32_1 = arith.constant 0 : i32
    return %c0_i32, %c0_i32_0 : i32, i32
  }
  func.func @transform_3(%arg0: i32, %arg1: i32) -> (i32, i32, i32) {
    %c0_i32 = arith.constant 0 : i32
    %c0_i32_0 = arith.constant 0 : i32
    return %arg0, %c0_i32, %arg1 : i32, i32, i32
  }
}

</mosaic_0001>

<bundles_post_ra>
// kernel: conv1x1_head_forward.1
= control target key start
LH: loop header
LB: loop body
LE: loop exit
PB: predicated region body
PF: predicated region fallthrough
CT: control target
= control target key end

     0   :  { %s479_s12 = smov 0   ;;  %s481_s13 = smov 0   ;;  %s518_s0 = inlined_call_operand.vmem [shape: f32[2,16,256], index: 0, kind: input, shape index: {}]   ;;  %s519_s1 = inlined_call_operand.vmem [shape: f32[3,16], index: 1, kind: input, shape index: {}]   ;;  %s520_s2 = inlined_call_operand.vmem [shape: f32[3,1], index: 2, kind: input, shape index: {}]   ;;  %s521_s3 = inlined_call_operand.vmem [shape: f32[2,3,256], index: 3, kind: output, shape index: {}]  }
   0x1   :  { %s483_s14 = smov 0  }
   0x2 LB: > { %s25_s15 = sadd.s32 1, %s451_s13  ;;  %p392_p0 = scmp.ge.s32.totalorder %s455_s14, 1  ;;  %s455_s14 = sphi %s483_s14, %s13_s14   ;;  %s451_s13 = sphi %s481_s13, %s523_s13   ;;  %s447_s12 = sphi %s479_s12, %s522_s12  }
   0x3   : > { %p27_p1 = scmp.ge.s32.totalorder %s25_s15, 2  ;;  %p158_p2 = scmp.lt.s32.totalorder %s455_s14, 3 }
   0x5   : > { %s525_s15 = smov (%p27_p1, %s25_s15), 0  ;;  %p159_p3 = pnand %p392_p0, %p158_p2 }
   0x6   : > { %p191_p4 = scmp.lt.s32.totalorder (!%p159_p3), %s447_s12, 1  ;;  %v457_v0 = vmov (!%p159_p3), 0.0   ;;  %v458_v1 = vmov (!%p159_p3), 0   ;;  %v215_v2 = vld [vmem:[%s520_s2] sm:$0x7] (!%p159_p3)  ;;  %vm221_vm0 = vcmask (!%p159_p3), 130048  }
   0x7   : > { %162 = sbr.rel (%p159_p3) target bundleno = 242 (0xf2), region = 32  ;;  %289 = vmatprep.mubr.f32.mxu0 (!%p159_p3), %v457_v0  ;;  %432 = vset.pattern.permute.xlu0 (!%p159_p3), %v458_v1  ;;  %v214_v9 = vld [vmem:[%s519_s1] sm:$0x7] (!%p159_p3) }
   0x8   : > { %218 = vperm.xlu0 (!%p159_p3), %432, %v215_v2  }
   0xe   : > { %s527_s12 = smov (!%p191_p4, %s447_s12), 1 }
   0xf   : > { %s400_s18 = sshll.u32 %s527_s12, 5  ;;  %s401_s24 = sshll.u32 %s527_s12, 3 }
  0x10   : > { %s198_s21 = scalar_lea.vmem %s518_s0, %s400_s18  ;;  %s208_s27 = scalar_lea.vmem %s521_s3, %s401_s24 }
  0x11   : > { %v211_v3 = vld [vmem:[%s198_s21 + $0x8] sm:$0xff]  ;;  %v213_v4 = vld [vmem:[%s198_s21 + $0x18] sm:$0xff]  ;;  %v210_v5 = vld [vmem:[%s198_s21] sm:$0xff] }
  0x12   : > { %v402_v6 = vpack.c.bf16 %v213_v4, %v211_v3  ;;  %v212_v7 = vld [vmem:[%s198_s21 + $0x10] sm:$0xff] }
  0x13   : > { %v404_v8 = vpack.c.bf16 %v212_v7, %v210_v5 }
  0x14   : > { %403 = vmatprep.subr.bf16.mxu0 %v402_v6 }
  0x15   : > { %405 = vmatpush1.bf16.msra.mxu0 %v404_v8 }
  0x18   : > { %397 = vmatmul.mubr.msk.f32.vlgmr.msra.gmra.mrb[0].mxu0 %vm221_vm0, %v214_v9 }
  0x87   : > { %v219_v10 = vpop.permute.xlu0 %218 }
  0xeb   : > { %v291_v11 = vpop.f32.mrb[0].mxu0 }
  0xec   : > { %v292_v12 = vadd.f32 %v291_v11, %v219_v10  ;;  %v293_v13 = vpop.f32.mrb[1].mxu0 }
  0xed   : > { %v294_v14 = vadd.f32 %v293_v13, %v219_v10 }
  0xef   : > { %v298_v15 = vcombine.low %v292_v12, %v294_v14 }
  0xf1   : > { %300 = vst [vmem:[%s208_s27] sm:$0x77] %v298_v15 }
  0xf2 PF: > { %s13_s14 = sadd.s32 1, %s455_s14   ;;  %s522_s12 = smov %s451_s13 }
  0xf3   : > { %p10_p5 = scmp.ge.s32.totalorder %s13_s14, 4   ;;  %s523_s13 = smov %s525_s15 }
  0xf5   :  { %12 = sbr.rel (!%p10_p5) target bundleno = 2 (0x2), region = 62 }

</bundles_post_ra>
